<compile_context>
chip_gen: v6e
topology: v6e:2x2x1
jax: 0.10.0
libtpu: 0.0.40
codegen_flags: <defaults>
</compile_context>

<pallas_src>
import math

import jax
import jax.numpy as jnp
from jax.experimental import pallas as pl
from jax.experimental.pallas import tpu as pltpu

_LANE = 128
_SUBLANE = 8
_TILE_BYTES_TARGET = 8 * 1024 * 1024   # <= 8 MiB/tile -> in+out x 2 bufs = 32 MiB pipeline
_VMEM_LIMIT_BYTES = 48 * 1024 * 1024   # headroom over 32 MiB, < v7x 64 MiB physical VMEM


def _copy_kernel(x_ref, o_ref):
    # Pure lane/sublane-dense copy: plain vld/vst, no VALU/XLU/relayout work.
    o_ref[...] = x_ref[...]


def _choose_slab(total: int):
    """Pick a lane-dense 2-D view (rows, L) of the flat buffer with L a large
    multiple of 128, decoupling tile shape from the (N, flat) geometry."""
    for lane_width in (8192, 4096, 2048, 1024, 512, 256, 128):
        if total % lane_width == 0:
            return total // lane_width, lane_width
    return None


def _tile(dim: int, unit: int, target: int) -> int:
    """Tile size for one axis: the full extent when it already fits the target,
    otherwise the largest multiple of `unit` <= target (cdiv grid masks the tail)."""
    if dim <= target:
        return dim                       # block == full array dim is always legal
    return max((target // unit) * unit, unit)


def _copy_2d(x2d: jax.Array) -> jax.Array:
    """Tiled identity copy of a 2-D slab (kept as a fusion site)."""
    rows, cols = x2d.shape
    itemsize = jnp.dtype(x2d.dtype).itemsize

    # Widen the lane dim first (biggest single lever for unmasked stores),
    # then grow rows until the tile reaches ~8 MiB.
    tn = _tile(cols, _LANE, 8192)
    max_rows = max(_TILE_BYTES_TARGET // max(tn * itemsize, 1), _SUBLANE)
    tm = _tile(rows, _SUBLANE, max_rows)

    grid = (pl.cdiv(rows, tm), pl.cdiv(cols, tn))

    return pl.pallas_call(
        _copy_kernel,
        out_shape=jax.ShapeDtypeStruct((rows, cols), x2d.dtype),
        grid=grid,
        in_specs=[pl.BlockSpec((tm, tn), lambda i, j: (i, j))],
        out_specs=pl.BlockSpec((tm, tn), lambda i, j: (i, j)),
        cost_estimate=pl.CostEstimate(
            flops=0,
            transcendentals=0,
            bytes_accessed=2 * rows * cols * itemsize,
        ),
        compiler_params=pltpu.CompilerParams(
            dimension_semantics=("parallel", "parallel"),
            vmem_limit_bytes=_VMEM_LIMIT_BYTES,
        ),
    )(x2d)


def flatten_layer(x: jax.Array) -> jax.Array:
    """Equivalent of FlattenLayer.forward: (N, ...) -> (N, prod(...))."""
    n = x.shape[0]
    flat = math.prod(x.shape[1:])  # math.prod(()) == 1

    # Row-major flatten == torch .view(n, -1); metadata-only in HLO.
    # TODO(synk): in production return x_flat directly (or fuse the downstream
    # consumer into _copy_kernel) — the copy below only exists as a fusion site.
    x_flat = x.reshape(n, flat)
    total = n * flat
    if total == 0:
        return x_flat

    slab = _choose_slab(total)
    if slab is not None:
        rows, lane_width = slab
        return _copy_2d(x_flat.reshape(rows, lane_width)).reshape(n, flat)

    # Awkward totals (not a multiple of 128): tile (n, flat) directly;
    # the cdiv grid masks the partial last block.
    return _copy_2d(x_flat)


if __name__ == "__main__":
    key = jax.random.PRNGKey(0)
    # Small NCHW input: batch=2, channels=4, spatial=16x16
    x = jax.random.normal(key, (2, 4, 16, 16), dtype=jnp.float32)

    y = flatten_layer(x)
    jax.block_until_ready(y)

    # Correctness vs. the reference semantics (torch .view row-major flatten).
    y_ref = x.reshape(x.shape[0], -1)
    assert y.shape == (2, 4 * 16 * 16), y.shape
    assert y.dtype == x.dtype
    assert jnp.array_equal(y, y_ref), "mismatch vs reference flatten"

    print("KERNEL_OK")
</pallas_src>

<mosaic_0001>
module attributes {stable_mosaic.version = 11 : i64} {
  func.func @_copy_kernel(%arg0: i32, %arg1: i32, %arg2: memref<1x2048xf32, #tpu.memory_space<vmem>>, %arg3: memref<1x2048xf32, #tpu.memory_space<vmem>>) attributes {dimension_semantics = [#tpu.dimension_semantics<parallel>, #tpu.dimension_semantics<parallel>], iteration_bounds = array<i64: 1, 1>, scalar_prefetch = 0 : i64, scratch_operands = 0 : i64, tpu.core_type = #tpu.core_type<tc>, window_params = [{transform_indices = @transform_0, window_bounds = array<i64: 1, 2048>}, {transform_indices = @transform_1, window_bounds = array<i64: 1, 2048>}]} {
    %c0 = arith.constant 0 : index
    %c0_0 = arith.constant 0 : index
    %0 = vector.load %arg2[%c0, %c0_0] : memref<1x2048xf32, #tpu.memory_space<vmem>>, vector<1x2048xf32>
    %c0_1 = arith.constant 0 : index
    %c0_2 = arith.constant 0 : index
    %1 = vector.load %arg3[%c0_1, %c0_2] : memref<1x2048xf32, #tpu.memory_space<vmem>>, vector<1x2048xf32>
    tpu.vector_store %arg3[%c0_1, %c0_2], %0 {strides = array<i32>} : memref<1x2048xf32, #tpu.memory_space<vmem>>, vector<1x2048xf32>,
    return
  }
  func.func @transform_0(%arg0: i32, %arg1: i32) -> (i32, i32) {
    %c0_i32 = arith.constant 0 : i32
    return %arg0, %arg1 : i32, i32
  }
  func.func @transform_1(%arg0: i32, %arg1: i32) -> (i32, i32) {
    %c0_i32 = arith.constant 0 : i32
    return %arg0, %arg1 : i32, i32
  }
}

</mosaic_0001>

<bundles_post_ra>
// kernel: tpu_custom_call.1
= control target key start
LH: loop header
LB: loop body
LE: loop exit
PB: predicated region body
PF: predicated region fallthrough
CT: control target
= control target key end

     0   :  { %6 = vsyncpa [#allocation3], 0  ;;  %s104_s0 = inlined_call_operand.hbm [shape: f32[1,2048], index: 0, kind: input, shape index: {}]   ;;  %s105_s1 = inlined_call_operand.hbm [shape: f32[1,2048], index: 1, kind: output, shape index: {}]  }
   0x1   :  { %7 = vsyncpa [#allocation4], 0  ;;  %s86_s6 = smov [#allocation2]  }
   0x2   :  { %s14_s7 = sshll.u32 %s86_s6, 4  ;;  %s15_s7 = int_to_ptr.vmem [resolvable:$true] %s14_s7 }
   0x3   :  { %s50_s8 = scalar_lea.vmem %s15_s7, 256  ;;  %p55_p1 = scmp.lt.s32.totalorder %s15_s7, %s15_s7 }
   0x4   :  { %p51_p0 = scmp.ne.s32.totalorder %s15_s7, %s50_s8  ;;  %p56_p2 = scmp.lt.s32.totalorder %s50_s8, %s50_s8 }
   0x6   :  { %p57_p3 = por %p56_p2, %p55_p1 }
   0x8   :  { %p58_p4 = pnand %p57_p3, %p51_p0 }
   0xa   :  { %61 = shalt.err (!%p58_p4)
}
   0xb   :  { %17 = dma.hbm_to_vmem [thread:$0]  %s104_s0, 256, %s15_s7, [#allocation3]  }
   0xc   :  { %82 = dma.done.wait [#allocation3], 256  }
   0xd   :  { %83 = vsyncadd [#allocation3], 4294967040  ;;  %s87_s11 = smov [#allocation5]   ;;  %v21_v0 = vld [vmem:[#allocation2] sm:$0xff]  ;;  %v22_v1 = vld [vmem:[#allocation2 + $0x8] sm:$0xff] }
   0xe   :  { %s31_s12 = sshll.u32 %s87_s11, 4  ;;  %23 = vst [vmem:[#allocation5] sm:$0xff] %v21_v0  ;;  %24 = vst [vmem:[#allocation5 + $0x8] sm:$0xff] %v22_v1  ;;  %s32_s12 = int_to_ptr.vmem [resolvable:$true] %s31_s12 }
   0xf   :  { %s62_s13 = scalar_lea.vmem %s32_s12, 256  ;;  %p67_p6 = scmp.lt.s32.totalorder %s32_s12, %s32_s12 }
  0x10   :  { %p63_p5 = scmp.ne.s32.totalorder %s32_s12, %s62_s13  ;;  %p68_p7 = scmp.lt.s32.totalorder %s62_s13, %s62_s13 }
  0x12   :  { %p69_p8 = por %p68_p7, %p67_p6 }
  0x14   :  { %p70_p9 = pnand %p69_p8, %p63_p5 }
  0x16   :  { %73 = shalt.err (!%p70_p9)
}
  0x17   :  { %34 = dma.vmem_to_hbm [thread:$0]  %s32_s12, 256, %s105_s1, [#allocation4]  }
  0x18   :  { %84 = dma.done.wait [#allocation4], 256  }
  0x19   :  { %85 = vsyncadd [#allocation4], 4294967040 }
  0x1a   :  { %38 = vsyncpa [#allocation3], 1 }
  0x1b   :  { %39 = vsyncpa [#allocation4], 1 }

</bundles_post_ra>
